<compile_context>
chip_gen: v6e
topology: v6e:2x2x1
jax: 0.10.0
libtpu: 0.0.40
codegen_flags: <defaults>
</compile_context>

<pallas_src>
import jax
import jax.numpy as jnp
from jax.experimental import pallas as pl
from jax.experimental.pallas import tpu as pltpu


def _make_pe_table(d_model: int, max_len: int = 100,
                   dtype=jnp.float32) -> jnp.ndarray:
    """Sinusoidal positional-encoding table, shape (1, max_len, d_model).

    Built once in `dtype` (hoists the per-call cast out of the hot path).
    """
    position = jnp.arange(0, max_len, dtype=jnp.float32)[:, None]          # (max_len, 1)
    div_term = jnp.exp(
        jnp.arange(0, d_model, 2, dtype=jnp.float32)
        * (-jnp.log(jnp.float32(10000.0)) / d_model)
    )                                                                       # (ceil(D/2),)
    pe = jnp.zeros((max_len, d_model), dtype=jnp.float32)
    pe = pe.at[:, 0::2].set(jnp.sin(position * div_term))
    # Slice so odd d_model also works; identical to PyTorch for even d_model.
    pe = pe.at[:, 1::2].set(jnp.cos(position * div_term[: d_model // 2]))
    return pe[None, :, :].astype(dtype)                                     # (1, max_len, D)


def _add_pe_kernel(x_ref, pe_ref, o_ref):
    # Pure VPU elementwise add; pe block (1, tS, D) broadcasts over the
    # leading (batch) dim of the x block inside the kernel — no re-DMA.
    o_ref[...] = x_ref[...] + pe_ref[...]


def _choose_tiles(B: int, S: int, D: int, itemsize: int, block_bytes: int):
    """Pick (tB, tS) so the x block is ~block_bytes and layout-legal.

    Legality: last two block dims must be multiples of (8, 128) OR equal the
    full array dims.  D is always passed as the full last dim, so only the
    seq-tile tS needs to be a multiple of 8 (or equal to S).
    """
    row_bytes = max(1, D * itemsize)
    rows_full_batch = block_bytes // max(1, B * row_bytes)
    if rows_full_batch >= 8 or rows_full_batch >= S:
        # Whole batch fits in the block: pe read exactly once per row tile.
        tB = B
        tS = min(S, max(8, (rows_full_batch // 8) * 8))
        if pl.cdiv(S, tS) == 1 and S >= 16:
            # Split into >= 2 row tiles so the single "parallel" grid axis can
            # be sharded across both TensorCores on v7x (neutral elsewhere).
            tS = min(tS, ((pl.cdiv(S, 2) + 7) // 8) * 8)
    else:
        # Batch too large for one block: tile the batch axis instead.
        tS = min(S, 8)
        tB = max(1, min(B, block_bytes // max(1, tS * row_bytes)))
    return tB, tS


def positional_encoding_forward(x: jnp.ndarray, pe: jnp.ndarray,
                                *, block_bytes: int = 2 * 1024 * 1024,
                                donate_x: bool = False) -> jnp.ndarray:
    """x: (B, S, D); pe: (1, max_len, D). Returns x + pe[:, :S]."""
    B, S, D = x.shape
    _, max_len, D_pe = pe.shape
    assert D == D_pe, f"d_model mismatch: x has {D}, pe has {D_pe}"
    assert S <= max_len, f"sequence length {S} exceeds table max_len {max_len}"

    if pe.dtype != x.dtype:
        # Fallback only — prefer building the table in the model dtype
        # (see _make_pe_table(dtype=...)) so this convert never runs per call.
        pe = pe.astype(x.dtype)

    itemsize = jnp.dtype(x.dtype).itemsize
    tB, tS = _choose_tiles(B, S, D, itemsize, block_bytes)

    # pe legality: the block's seq dim must be a multiple of 8 or equal pe's
    # full seq extent.  Only if tS == S with S % 8 != 0 do we take a tiny
    # (1, S, D) slice; otherwise the full table is indexed via the index_map.
    pe_in = pe if (tS % 8 == 0 or tS == max_len) else pe[:, :S, :]

    aliases = {0: 0} if donate_x else {}

    if tB == B:
        # ---- Batch-in-block path: grid over row tiles only ----
        grid = (pl.cdiv(S, tS),)
        in_specs = [
            pl.BlockSpec((B, tS, D), lambda s: (0, s, 0)),   # x tile (full batch)
            pl.BlockSpec((1, tS, D), lambda s: (0, s, 0)),   # pe tile, read once
        ]
        out_spec = pl.BlockSpec((B, tS, D), lambda s: (0, s, 0))
        semantics = ("parallel",)
    else:
        # ---- Batch-tiled path: batch innermost so pe's block index is
        # unchanged across consecutive steps and its DMA is skipped. ----
        grid = (pl.cdiv(S, tS), pl.cdiv(B, tB))
        in_specs = [
            pl.BlockSpec((tB, tS, D), lambda s, b: (b, s, 0)),
            pl.BlockSpec((1, tS, D), lambda s, b: (0, s, 0)),
        ]
        out_spec = pl.BlockSpec((tB, tS, D), lambda s, b: (b, s, 0))
        semantics = ("parallel", "parallel")

    return pl.pallas_call(
        _add_pe_kernel,
        out_shape=jax.ShapeDtypeStruct((B, S, D), x.dtype),
        grid=grid,
        in_specs=in_specs,
        out_specs=out_spec,
        input_output_aliases=aliases,
        compiler_params=pltpu.CompilerParams(dimension_semantics=semantics),
    )(x, pe_in)


if __name__ == "__main__":
    # Small shapes consistent with the module: batch=2, seq=8, d_model=32.
    B, S, D = 2, 8, 32
    MAX_LEN = 100

    key = jax.random.PRNGKey(0)
    x = jax.random.normal(key, (B, S, D), dtype=jnp.float32)

    pe = _make_pe_table(D, MAX_LEN, dtype=x.dtype)   # built once in model dtype

    out = positional_encoding_forward(x, pe)
    out = jax.block_until_ready(out)

    # Reference check against plain-JAX semantics of the PyTorch forward.
    ref = x + pe[:, :S]
    assert out.shape == (B, S, D)
    assert jnp.allclose(out, ref, atol=1e-6, rtol=1e-6), "mismatch vs reference"

    print("KERNEL_OK")
</pallas_src>

<mosaic_0001>
module attributes {stable_mosaic.version = 11 : i64} {
  func.func @_add_pe_kernel(%arg0: i32, %arg1: memref<2x8x32xf32, #tpu.memory_space<vmem>>, %arg2: memref<1x8x32xf32, #tpu.memory_space<vmem>>, %arg3: memref<2x8x32xf32, #tpu.memory_space<vmem>>) attributes {dimension_semantics = [#tpu.dimension_semantics<parallel>], iteration_bounds = array<i64: 1>, scalar_prefetch = 0 : i64, scratch_operands = 0 : i64, tpu.core_type = #tpu.core_type<tc>, window_params = [{transform_indices = @transform_0, window_bounds = array<i64: 2, 8, 32>}, {transform_indices = @transform_1, window_bounds = array<i64: 1, 8, 32>}, {transform_indices = @transform_2, window_bounds = array<i64: 2, 8, 32>}]} {
    %c0 = arith.constant 0 : index
    %c0_0 = arith.constant 0 : index
    %c0_1 = arith.constant 0 : index
    %0 = vector.load %arg1[%c0, %c0_0, %c0_1] : memref<2x8x32xf32, #tpu.memory_space<vmem>>, vector<2x8x32xf32>
    %c0_2 = arith.constant 0 : index
    %c0_3 = arith.constant 0 : index
    %c0_4 = arith.constant 0 : index
    %1 = vector.load %arg2[%c0_2, %c0_3, %c0_4] : memref<1x8x32xf32, #tpu.memory_space<vmem>>, vector<1x8x32xf32>
    %2 = vector.broadcast %1 : vector<1x8x32xf32> to vector<2x8x32xf32>
    %3 = arith.addf %0, %2 : vector<2x8x32xf32>
    %c0_5 = arith.constant 0 : index
    %c0_6 = arith.constant 0 : index
    %c0_7 = arith.constant 0 : index
    %4 = vector.load %arg3[%c0_5, %c0_6, %c0_7] : memref<2x8x32xf32, #tpu.memory_space<vmem>>, vector<2x8x32xf32>
    tpu.vector_store %arg3[%c0_5, %c0_6, %c0_7], %3 {strides = array<i32>} : memref<2x8x32xf32, #tpu.memory_space<vmem>>, vector<2x8x32xf32>,
    return
  }
  func.func @transform_0(%arg0: i32) -> (i32, i32, i32) {
    %c0_i32 = arith.constant 0 : i32
    %c0_i32_0 = arith.constant 0 : i32
    %c0_i32_1 = arith.constant 0 : i32
    return %c0_i32, %arg0, %c0_i32_0 : i32, i32, i32
  }
  func.func @transform_1(%arg0: i32) -> (i32, i32, i32) {
    %c0_i32 = arith.constant 0 : i32
    %c0_i32_0 = arith.constant 0 : i32
    %c0_i32_1 = arith.constant 0 : i32
    return %c0_i32, %arg0, %c0_i32_0 : i32, i32, i32
  }
  func.func @transform_2(%arg0: i32) -> (i32, i32, i32) {
    %c0_i32 = arith.constant 0 : i32
    %c0_i32_0 = arith.constant 0 : i32
    %c0_i32_1 = arith.constant 0 : i32
    return %c0_i32, %arg0, %c0_i32_0 : i32, i32, i32
  }
}

</mosaic_0001>

<bundles_post_ra>
// kernel: tpu_custom_call.1
= control target key start
LH: loop header
LB: loop body
LE: loop exit
PB: predicated region body
PF: predicated region fallthrough
CT: control target
= control target key end

     0   :  { %vm17_vm0 = vcmask 261120   ;;  %s91_s0 = inlined_call_operand.vmem [shape: f32[2,8,32], index: 0, kind: input, shape index: {}]   ;;  %s92_s1 = inlined_call_operand.vmem [shape: f32[1,100,32], index: 1, kind: input, shape index: {}]   ;;  %s93_s2 = inlined_call_operand.hbm [shape: f32[2,8,32], index: 2, kind: output, shape index: {}]  }
   0x1   :  { %v12_v0 = vld [vmem:[%s91_s0] sm:$0xff]  ;;  %v13_v2 = vld [vmem:[%s91_s0 + $0x8] sm:$0xff] }
   0x2   :  { %v14_v1 = vld [vmem:[%s92_s1] sm:$0xff] }
   0x3   :  { %v15_v3 = vadd.f32 %v14_v1, %v12_v0  ;;  %v16_v4 = vadd.f32 %v14_v1, %v13_v2 }
   0x4   :  { %7 = vsyncpa [#allocation3], 0  ;;  %s61_s15 = smov [#allocation2]  }
   0x5   :  { %s25_s16 = sshll.u32 %s61_s15, 4  ;;  %18 = vst.msk [vmem:[#allocation2] sm:$0xff] %vm17_vm0, %v15_v3  ;;  %19 = vst.msk [vmem:[#allocation2 + $0x8] sm:$0xff] %vm17_vm0, %v16_v4  ;;  %s26_s16 = int_to_ptr.vmem [resolvable:$true] %s25_s16 }
   0x6   :  { %s39_s17 = scalar_lea.vmem %s26_s16, 256  ;;  %p44_p1 = scmp.lt.s32.totalorder %s26_s16, %s26_s16 }
   0x7   :  { %p40_p0 = scmp.ne.s32.totalorder %s26_s16, %s39_s17  ;;  %p45_p2 = scmp.lt.s32.totalorder %s39_s17, %s39_s17 }
   0x9   :  { %p46_p3 = por %p45_p2, %p44_p1 }
   0xb   :  { %p47_p4 = pnand %p46_p3, %p40_p0 }
   0xd   :  { %50 = shalt.err (!%p47_p4)
}
   0xe   :  { %s62_s1 = smov 128   ;;  %s63_s18 = smov 8  }
   0xf   :  { %31 = dma.vmem_to_hbm [thread:$0]  %s26_s16, 256, %s93_s2, [#allocation3], %s62_s1, %s62_s1, %s63_s18  }
  0x10   :  { %59 = dma.done.wait [#allocation3], 256  }
  0x11   :  { %60 = vsyncadd [#allocation3], 4294967040 }
  0x12   :  { %35 = vsyncpa [#allocation3], 1 }

</bundles_post_ra>
